<compile_context>
chip_gen: v7x
topology: tpu7x:2x2x1
jax: 0.10.0
libtpu: 0.0.40
codegen_flags: <defaults>
</compile_context>

<pallas_src>
import functools

import jax
import jax.numpy as jnp
from jax import lax
from jax.experimental import pallas as pl
from jax.experimental.pallas import tpu as pltpu


def _round_up(x, m):
    return ((x + m - 1) // m) * m


def _vmem_capacity_bytes():
    try:
        return int(pltpu.get_tpu_info().vmem_capacity_bytes)
    except Exception:
        return 128 * 1024 * 1024  # conservative fallback if the query is unavailable


# --------------------------------------------------------------------------- kernels
def _fused_linear_bn_kernel(v_ref, w_ref, b_ref, g_ref, beta_ref, o_ref, *, n_rows, eps):
    """Single-launch path: h = V @ W^T + b ; y = gamma*(h-mean)*rsqrt(var+eps) + beta."""
    h = lax.dot_general(v_ref[...], w_ref[...], (((1,), (1,)), ((), ())),
                        preferred_element_type=jnp.float32) + b_ref[...]
    inv_n = 1.0 / float(n_rows)
    mean = jnp.sum(h, axis=0, keepdims=True) * inv_n
    hc = h - mean                                    # centered -> stable variance
    var = jnp.sum(hc * hc, axis=0, keepdims=True) * inv_n
    inv_std = lax.rsqrt(var + eps)                   # EUP rsqrt, off the VALU critical path
    o_ref[...] = (hc * (g_ref[...] * inv_std) + beta_ref[...]).astype(o_ref.dtype)


def _linear_stats_kernel(v_ref, w_ref, b_ref, stats_ref, *, n_rows, tile_rows):
    """Tiled pass 1: per-tile column sum + centered sum-of-squares of h = V @ W^T + b.

    Only the (8, d) stats block goes back to HBM (no h round trip).  Rows past n_rows in
    the ragged last tile are masked out (Pallas OOB block reads are undefined)."""
    i = pl.program_id(0)
    rows_left = n_rows - i * tile_rows
    cnt = jnp.minimum(rows_left, tile_rows).astype(jnp.float32)
    valid = lax.broadcasted_iota(jnp.int32, (tile_rows, 1), 0) < rows_left

    h = lax.dot_general(v_ref[...], w_ref[...], (((1,), (1,)), ((), ())),
                        preferred_element_type=jnp.float32) + b_ref[...]
    hm = jnp.where(valid, h, 0.0)
    col_sum = jnp.sum(hm, axis=0, keepdims=True)                     # (1, d)
    tile_mean = col_sum / cnt
    dev = jnp.where(valid, h - tile_mean, 0.0)
    col_m2 = jnp.sum(dev * dev, axis=0, keepdims=True)               # (1, d)

    # Build the (8, d) stats block in registers and do ONE full store (row 0 = sum,
    # row 1 = centered sum-of-squares, rows 2..7 = 0): no zero-fill + masked sublane writes.
    row = lax.broadcasted_iota(jnp.int32, (8, col_sum.shape[1]), 0)
    stats_ref[...] = jnp.where(row == 0, col_sum,
                               jnp.where(row == 1, col_m2, 0.0))


def _linear_scale_shift_kernel(v_ref, w_ref, scale_ref, shift_ref, o_ref):
    """Tiled pass 2: recompute h = V @ W^T and apply the folded BN affine in the epilogue."""
    h = lax.dot_general(v_ref[...], w_ref[...], (((1,), (1,)), ((), ())),
                        preferred_element_type=jnp.float32)
    o_ref[...] = (h * scale_ref[...] + shift_ref[...]).astype(o_ref.dtype)


# --------------------------------------------------------------------------- wrapper
def v_package_forward(inputs, operation, operation_name, params=None,
                      eps=1e-5, tile_rows=None, max_fused_bytes=None):
    """Pallas equivalent of V_Package.forward (training-mode batch statistics)."""
    V = operation(inputs)

    if operation_name in ("V_None", "V_I") or params is None:
        # No fc/bn sequence: pure pass-through.  The fastest copy is no copy -> no kernel.
        return V

    W, b, gamma, beta = params
    n, d = V.shape
    out_dtype = V.dtype
    itemsize = jnp.dtype(V.dtype).itemsize

    # Keep V (and therefore W) in the input dtype: bf16 stays bf16 (MXU-native, half the
    # HBM traffic); accumulation is always fp32 via preferred_element_type.
    w_c = jnp.asarray(W, dtype=V.dtype)                               # (d, d), tiny
    b_c = jnp.asarray(b, dtype=jnp.float32).reshape(1, d)
    gamma_c = (jnp.ones((d,), jnp.float32) if gamma is None
               else jnp.asarray(gamma, jnp.float32))
    beta_c = (jnp.zeros((d,), jnp.float32) if beta is None
              else jnp.asarray(beta, jnp.float32))

    vmem_cap = _vmem_capacity_bytes()
    vmem_limit = int(min(48 * 1024 * 1024, (vmem_cap * 3) // 4))      # v7x-safe (<=48 MiB)
    if max_fused_bytes is None:
        # ~24 MiB on 128 MiB parts (v5e/v6e), automatically lower on v7x (64 MiB VMEM).
        max_fused_bytes = min(24 * 1024 * 1024, vmem_cap // 3)

    # ---------------- small / medium case: one fused kernel, everything resident in VMEM.
    fused_bytes = (2 * 2 * n * d * itemsize        # V in + out (double-buffered estimate)
                   + n * d * 4                     # fp32 h temporary
                   + 2 * d * d * itemsize          # weight
                   + 16 * d * 4)                   # bias / gamma / beta / stats rows
    if fused_bytes <= max_fused_bytes:
        return pl.pallas_call(
            functools.partial(_fused_linear_bn_kernel, n_rows=n, eps=eps),
            out_shape=jax.ShapeDtypeStruct((n, d), out_dtype),
            grid=(1,),
            in_specs=[
                pl.BlockSpec((n, d), lambda i: (0, 0)),
                pl.BlockSpec((d, d), lambda i: (0, 0)),
                pl.BlockSpec((1, d), lambda i: (0, 0)),
                pl.BlockSpec((1, d), lambda i: (0, 0)),
                pl.BlockSpec((1, d), lambda i: (0, 0)),
            ],
            out_specs=pl.BlockSpec((n, d), lambda i: (0, 0)),
            compiler_params=pltpu.CompilerParams(
                dimension_semantics=("arbitrary",),
                vmem_limit_bytes=vmem_limit),
        )(V, w_c, b_c, gamma_c.reshape(1, d), beta_c.reshape(1, d))

    # ---------------- large case: row-tiled, two passes (BN needs full-batch statistics).
    # Pass 1 emits only per-tile stats; pass 2 recomputes the matmul (cheap, d lanes) and
    # applies the folded BN scale/shift -> no fp32 h round trip through HBM.
    if tile_rows is None:
        tile_rows = (2 << 20) // max(d * itemsize, 1)    # ~2 MiB of V per grid step
        tile_rows = max(256, min(8192, tile_rows))
    tile_rows = int(min(tile_rows, _round_up(n, 8)))
    tile_rows = max(8, _round_up(tile_rows, 8))
    n_tiles = int(pl.cdiv(n, tile_rows))

    # NOTE: W / b / scale / shift have constant index_maps, so Pallas does not re-copy
    # them between grid steps.  (pl.Buffered(1) could additionally drop their second VMEM
    # buffer, which only matters for very large node_dim.)
    stats = pl.pallas_call(
        functools.partial(_linear_stats_kernel, n_rows=n, tile_rows=tile_rows),
        out_shape=jax.ShapeDtypeStruct((8 * n_tiles, d), jnp.float32),
        grid=(n_tiles,),
        in_specs=[
            pl.BlockSpec((tile_rows, d), lambda i: (i, 0)),
            pl.BlockSpec((d, d), lambda i: (0, 0)),
            pl.BlockSpec((1, d), lambda i: (0, 0)),
        ],
        out_specs=pl.BlockSpec((8, d), lambda i: (i, 0)),
        compiler_params=pltpu.CompilerParams(
            dimension_semantics=("parallel",),
            vmem_limit_bytes=vmem_limit),
    )(V, w_c, b_c)

    # Tiny host-side combine of per-tile stats (chunked / centered variance).
    counts = jnp.asarray([min(tile_rows, n - i * tile_rows) for i in range(n_tiles)],
                         dtype=jnp.float32)[:, None]                  # (n_tiles, 1) static
    tile_sums = stats[0::8]                                           # (n_tiles, d)
    tile_m2 = stats[1::8]                                             # (n_tiles, d)
    mean = jnp.sum(tile_sums, axis=0) / n
    tile_means = tile_sums / counts
    var = (jnp.sum(tile_m2, axis=0)
           + jnp.sum(counts * (tile_means - mean) ** 2, axis=0)) / n
    inv_std = lax.rsqrt(jnp.maximum(var, 0.0) + eps)
    scale = gamma_c * inv_std                                         # (d,)
    shift = (b_c[0] - mean) * scale + beta_c                          # Linear bias folded in

    out = pl.pallas_call(
        _linear_scale_shift_kernel,
        out_shape=jax.ShapeDtypeStruct((n, d), out_dtype),
        grid=(n_tiles,),
        in_specs=[
            pl.BlockSpec((tile_rows, d), lambda i: (i, 0)),
            pl.BlockSpec((d, d), lambda i: (0, 0)),
            pl.BlockSpec((1, d), lambda i: (0, 0)),
            pl.BlockSpec((1, d), lambda i: (0, 0)),
        ],
        out_specs=pl.BlockSpec((tile_rows, d), lambda i: (i, 0)),
        compiler_params=pltpu.CompilerParams(
            dimension_semantics=("parallel",),
            vmem_limit_bytes=vmem_limit),
    )(V, w_c, scale.reshape(1, d), shift.reshape(1, d))
    return out


# --------------------------------------------------------------------------- demo / check
if __name__ == "__main__":
    key = jax.random.PRNGKey(0)
    kg, kv, ke, kw, kb, kv2 = jax.random.split(key, 6)

    num_nodes, node_dim, edge_dim = 16, 32, 8
    G = jax.random.normal(kg, (num_nodes, num_nodes), dtype=jnp.float32)
    V = jax.random.normal(kv, (num_nodes, node_dim), dtype=jnp.float32)
    E = jax.random.normal(ke, (num_nodes, num_nodes, edge_dim), dtype=jnp.float32)

    identity_op = lambda inp: inp[1]  # V_I-style candidate operation

    # 1) V_I / V_None path: pure pass-through, no kernel launched.
    out_id = jax.block_until_ready(v_package_forward((G, V, E), identity_op, "V_I"))
    assert out_id.shape == V.shape and out_id.dtype == V.dtype
    assert bool(jnp.array_equal(out_id, V))

    # fc + bn parameters (PyTorch defaults: gamma=1, beta=0; training-mode batch stats).
    W = 0.1 * jax.random.normal(kw, (node_dim, node_dim), dtype=jnp.float32)
    b = 0.1 * jax.random.normal(kb, (node_dim,), dtype=jnp.float32)
    gamma = jnp.ones((node_dim,), dtype=jnp.float32)
    beta = jnp.zeros((node_dim,), dtype=jnp.float32)
    eps = 1e-5

    def reference(Vx, Wx=W):
        h = Vx @ Wx.T + b
        mean = jnp.mean(h, axis=0)
        var = jnp.var(h, axis=0)  # biased variance == training-mode BatchNorm1d
        return gamma * (h - mean) * lax.rsqrt(var + eps) + beta

    # 2) Non-identity op name -> fused Linear + BatchNorm kernel (single launch).
    out_small = jax.block_until_ready(
        v_package_forward((G, V, E), identity_op, "V_Dense",
                          params=(W, b, gamma, beta), eps=eps))
    assert out_small.shape == (num_nodes, node_dim) and out_small.dtype == V.dtype
    assert bool(jnp.allclose(out_small, reference(V), rtol=1e-4, atol=1e-4))

    # 3) Larger node count (not a tile multiple) -> tiled two-pass path with row masking.
    n_big = 200
    V_big = jax.random.normal(kv2, (n_big, node_dim), dtype=jnp.float32)
    out_big = jax.block_until_ready(
        v_package_forward((G, V_big, E), identity_op, "V_Dense",
                          params=(W, b, gamma, beta), eps=eps,
                          tile_rows=128, max_fused_bytes=0))
    assert out_big.shape == (n_big, node_dim)
    assert bool(jnp.allclose(out_big, reference(V_big), rtol=1e-4, atol=1e-4))

    # 4) bf16 input stays bf16 end-to-end (fp32 accumulation inside the kernel).
    V_bf16 = V.astype(jnp.bfloat16)
    out_bf16 = jax.block_until_ready(
        v_package_forward((G, V_bf16, E), identity_op, "V_Dense",
                          params=(W, b, gamma, beta), eps=eps))
    assert out_bf16.shape == (num_nodes, node_dim) and out_bf16.dtype == jnp.bfloat16
    ref_bf16 = reference(V_bf16.astype(jnp.float32),
                         W.astype(jnp.bfloat16).astype(jnp.float32))
    assert bool(jnp.allclose(out_bf16.astype(jnp.float32), ref_bf16, rtol=5e-2, atol=5e-2))

    print("KERNEL_OK")
</pallas_src>

<mosaic_0001>
module attributes {stable_mosaic.version = 11 : i64} {
  func.func @_fused_linear_bn_kernel(%arg0: i32, %arg1: memref<16x32xf32, #tpu.memory_space<vmem>>, %arg2: memref<32x32xf32, #tpu.memory_space<vmem>>, %arg3: memref<1x32xf32, #tpu.memory_space<vmem>>, %arg4: memref<1x32xf32, #tpu.memory_space<vmem>>, %arg5: memref<1x32xf32, #tpu.memory_space<vmem>>, %arg6: memref<16x32xf32, #tpu.memory_space<vmem>>) attributes {dimension_semantics = [#tpu.dimension_semantics<arbitrary>], iteration_bounds = array<i64: 1>, scalar_prefetch = 0 : i64, scratch_operands = 0 : i64, tpu.core_type = #tpu.core_type<tc>, window_params = [{pipeline_mode = #tpu.pipeline_mode<synchronous>, transform_indices = @transform_0, window_bounds = array<i64: 16, 32>}, {pipeline_mode = #tpu.pipeline_mode<synchronous>, transform_indices = @transform_1, window_bounds = array<i64: 32, 32>}, {pipeline_mode = #tpu.pipeline_mode<synchronous>, transform_indices = @transform_2, window_bounds = array<i64: 1, 32>}, {pipeline_mode = #tpu.pipeline_mode<synchronous>, transform_indices = @transform_3, window_bounds = array<i64: 1, 32>}, {pipeline_mode = #tpu.pipeline_mode<synchronous>, transform_indices = @transform_4, window_bounds = array<i64: 1, 32>}, {pipeline_mode = #tpu.pipeline_mode<synchronous>, transform_indices = @transform_5, window_bounds = array<i64: 16, 32>}]} {
    %c0 = arith.constant 0 : index
    %c0_0 = arith.constant 0 : index
    %0 = vector.load %arg1[%c0, %c0_0] : memref<16x32xf32, #tpu.memory_space<vmem>>, vector<16x32xf32>
    %c0_1 = arith.constant 0 : index
    %c0_2 = arith.constant 0 : index
    %1 = vector.load %arg2[%c0_1, %c0_2] : memref<32x32xf32, #tpu.memory_space<vmem>>, vector<32x32xf32>
    %cst = arith.constant dense<0.000000e+00> : vector<16x32xf32>
    %2 = tpu.matmul %0, %1, %cst {dimension_numbers = #tpu.dot_dimension_numbers<[1], [1], [0], [0], [0, 0, 1, 0], [], []>} : vector<16x32xf32>, vector<32x32xf32>, vector<16x32xf32> -> vector<16x32xf32>
    %c0_3 = arith.constant 0 : index
    %c0_4 = arith.constant 0 : index
    %3 = vector.load %arg3[%c0_3, %c0_4] : memref<1x32xf32, #tpu.memory_space<vmem>>, vector<1x32xf32>
    %4 = vector.broadcast %3 : vector<1x32xf32> to vector<16x32xf32>
    %5 = arith.addf %2, %4 : vector<16x32xf32>
    %cst_5 = arith.constant dense<0.000000e+00> : vector<32xf32>
    %6 = vector.multi_reduction <add>, %5, %cst_5 [0] : vector<16x32xf32> to vector<32xf32>
    %7 = vector.shape_cast %6 : vector<32xf32> to vector<1x32xf32>
    %cst_6 = arith.constant 6.250000e-02 : f32
    %8 = vector.broadcast %cst_6 : f32 to vector<1x32xf32>
    %9 = arith.mulf %7, %8 : vector<1x32xf32>
    %10 = vector.broadcast %9 : vector<1x32xf32> to vector<16x32xf32>
    %11 = arith.subf %5, %10 : vector<16x32xf32>
    %12 = arith.mulf %11, %11 : vector<16x32xf32>
    %cst_7 = arith.constant dense<0.000000e+00> : vector<32xf32>
    %13 = vector.multi_reduction <add>, %12, %cst_7 [0] : vector<16x32xf32> to vector<32xf32>
    %14 = vector.shape_cast %13 : vector<32xf32> to vector<1x32xf32>
    %cst_8 = arith.constant 6.250000e-02 : f32
    %15 = vector.broadcast %cst_8 : f32 to vector<1x32xf32>
    %16 = arith.mulf %14, %15 : vector<1x32xf32>
    %cst_9 = arith.constant 9.99999974E-6 : f32
    %17 = vector.broadcast %cst_9 : f32 to vector<1x32xf32>
    %18 = arith.addf %16, %17 : vector<1x32xf32>
    %19 = math.rsqrt %18 : vector<1x32xf32>
    %c0_10 = arith.constant 0 : index
    %c0_11 = arith.constant 0 : index
    %20 = vector.load %arg4[%c0_10, %c0_11] : memref<1x32xf32, #tpu.memory_space<vmem>>, vector<1x32xf32>
    %21 = arith.mulf %20, %19 : vector<1x32xf32>
    %22 = vector.broadcast %21 : vector<1x32xf32> to vector<16x32xf32>
    %23 = arith.mulf %11, %22 : vector<16x32xf32>
    %c0_12 = arith.constant 0 : index
    %c0_13 = arith.constant 0 : index
    %24 = vector.load %arg5[%c0_12, %c0_13] : memref<1x32xf32, #tpu.memory_space<vmem>>, vector<1x32xf32>
    %25 = vector.broadcast %24 : vector<1x32xf32> to vector<16x32xf32>
    %26 = arith.addf %23, %25 : vector<16x32xf32>
    %c0_14 = arith.constant 0 : index
    %c0_15 = arith.constant 0 : index
    %27 = vector.load %arg6[%c0_14, %c0_15] : memref<16x32xf32, #tpu.memory_space<vmem>>, vector<16x32xf32>
    tpu.vector_store %arg6[%c0_14, %c0_15], %26 {strides = array<i32>} : memref<16x32xf32, #tpu.memory_space<vmem>>, vector<16x32xf32>,
    return
  }
  func.func @transform_0(%arg0: i32) -> (i32, i32) {
    %c0_i32 = arith.constant 0 : i32
    %c0_i32_0 = arith.constant 0 : i32
    %c0_i32_1 = arith.constant 0 : i32
    return %c0_i32, %c0_i32_0 : i32, i32
  }
  func.func @transform_1(%arg0: i32) -> (i32, i32) {
    %c0_i32 = arith.constant 0 : i32
    %c0_i32_0 = arith.constant 0 : i32
    %c0_i32_1 = arith.constant 0 : i32
    return %c0_i32, %c0_i32_0 : i32, i32
  }
  func.func @transform_2(%arg0: i32) -> (i32, i32) {
    %c0_i32 = arith.constant 0 : i32
    %c0_i32_0 = arith.constant 0 : i32
    %c0_i32_1 = arith.constant 0 : i32
    return %c0_i32, %c0_i32_0 : i32, i32
  }
  func.func @transform_3(%arg0: i32) -> (i32, i32) {
    %c0_i32 = arith.constant 0 : i32
    %c0_i32_0 = arith.constant 0 : i32
    %c0_i32_1 = arith.constant 0 : i32
    return %c0_i32, %c0_i32_0 : i32, i32
  }
  func.func @transform_4(%arg0: i32) -> (i32, i32) {
    %c0_i32 = arith.constant 0 : i32
    %c0_i32_0 = arith.constant 0 : i32
    %c0_i32_1 = arith.constant 0 : i32
    return %c0_i32, %c0_i32_0 : i32, i32
  }
  func.func @transform_5(%arg0: i32) -> (i32, i32) {
    %c0_i32 = arith.constant 0 : i32
    %c0_i32_0 = arith.constant 0 : i32
    %c0_i32_1 = arith.constant 0 : i32
    return %c0_i32, %c0_i32_0 : i32, i32
  }
}

</mosaic_0001>

<bundles_post_ra>
// kernel: tpu_custom_call.1
= control target key start
LH: loop header
LB: loop body
LE: loop exit
PB: predicated region body
PF: predicated region fallthrough
CT: control target
= control target key end

     0   :  { %10 = vsyncpa [#allocation3], 0  ;;  %s436_s0 = inlined_call_operand.hbm [shape: f32[16,32], index: 0, kind: input, shape index: {}]   ;;  %s437_s1 = inlined_call_operand.hbm [shape: f32[32,32], index: 1, kind: input, shape index: {}]   ;;  %s438_s2 = inlined_call_operand.vmem [shape: f32[1,32], index: 2, kind: input, shape index: {}]   ;;  %s439_s3 = inlined_call_operand.vmem [shape: f32[1,32], index: 3, kind: input, shape index: {}]   ;;  %s440_s4 = inlined_call_operand.vmem [shape: f32[1,32], index: 4, kind: input, shape index: {}]   ;;  %s441_s5 = inlined_call_operand.hbm [shape: f32[16,32], index: 5, kind: output, shape index: {}]  }
   0x1   :  { %11 = vsyncpa [#allocation6], 0 }
   0x2   :  { %12 = vsyncpa [#allocation4], 0  ;;  %s337_s18 = smov [#allocation2]   ;;  %s265_s22 = scalar_lea.hbm %s436_s0, 256 }
   0x3   :  { %s18_s19 = sshll.u32 %s337_s18, 4  ;;  %p266_p0 = scmp.ne.s32.totalorder %s436_s0, %s265_s22  ;;  %s19_s19 = int_to_ptr.vmem [resolvable:$true] %s18_s19 }
   0x4   :  { %p269_p1 = scmp.lt.u32.totalorder %s265_s22, %s436_s0 }
   0x6   :  { %p271_p2 = pnand %p269_p1, %p266_p0 }
   0x8   :  { %274 = shalt.err (!%p271_p2)
}
   0x9   :  { %s275_s27 = scalar_lea.vmem %s19_s19, 256  ;;  %p280_p4 = scmp.lt.s32.totalorder %s19_s19, %s19_s19 }
   0xa   :  { %p276_p3 = scmp.ne.s32.totalorder %s19_s19, %s275_s27  ;;  %p281_p5 = scmp.lt.s32.totalorder %s275_s27, %s275_s27 }
   0xc   :  { %p282_p6 = por %p281_p5, %p280_p4 }
   0xe   :  { %p283_p7 = pnand %p282_p6, %p276_p3 }
  0x10   :  { %286 = shalt.err (!%p283_p7)
}
  0x11   :  { %s338_s28 = smov 128   ;;  %s339_s29 = smov 8  }
  0x12   :  { %24 = dma.hbm_to_vmem [thread:$0]  %s436_s0, 256, %s19_s19, [#allocation3], %s338_s28, %s338_s28, %s339_s29  }
  0x13   :  { %s340_s7 = smov [#allocation5]   ;;  %s287_s11 = scalar_lea.hbm %s437_s1, 512 }
  0x14   :  { %s30_s8 = sshll.u32 %s340_s7, 4  ;;  %p288_p8 = scmp.ne.s32.totalorder %s437_s1, %s287_s11  ;;  %s31_s8 = int_to_ptr.vmem [resolvable:$true] %s30_s8 }
  0x15   :  { %p291_p9 = scmp.lt.u32.totalorder %s287_s11, %s437_s1 }
  0x17   :  { %p293_p10 = pnand %p291_p9, %p288_p8 }
  0x19   :  { %296 = shalt.err (!%p293_p10)
}
  0x1a   :  { %s297_s16 = scalar_lea.vmem %s31_s8, 512  ;;  %p302_p12 = scmp.lt.s32.totalorder %s31_s8, %s31_s8 }
  0x1b   :  { %p298_p11 = scmp.ne.s32.totalorder %s31_s8, %s297_s16  ;;  %p303_p13 = scmp.lt.s32.totalorder %s297_s16, %s297_s16 }
  0x1d   :  { %p304_p0 = por %p303_p13, %p302_p12 }
  0x1f   :  { %p305_p1 = pnand %p304_p0, %p298_p11 }
  0x21   :  { %308 = shalt.err (!%p305_p1)
}
  0x22   :  { %36 = dma.hbm_to_vmem [thread:$0]  %s437_s1, 512, %s31_s8, [#allocation6], %s338_s28, %s338_s28, %s339_s29  }
  0x23   :  { %331 = dma.done.wait [#allocation3], 256  }
  0x24   :  { %332 = vsyncadd [#allocation3], 4294967040 }
  0x25   :  { %333 = dma.done.wait [#allocation6], 512  }
  0x26   :  { %334 = vsyncadd [#allocation6], 4294966784  ;;  %vm62_vm0 = vcmask 261120   ;;  %v51_v0 = vld [vmem:[#allocation5] sm:$0xff]  ;;  %v52_v1 = vld [vmem:[#allocation5 + $0x8] sm:$0xff]  ;;  %v185_v38 = vlaneseq  ;;  %s341_s22 = smov [#allocation7]  }
  0x27   :  { %vm247_vm1 = vmpackc.low %vm62_vm0, %vm62_vm0  ;;  %v53_v2 = vld [vmem:[#allocation5 + $0x10] sm:$0xff]  ;;  %v246_v3 = vpack.c.bf16 %v52_v1, %v51_v0  ;;  %v54_v4 = vld [vmem:[#allocation5 + $0x18] sm:$0xff]  ;;  %s208_s23 = sshll.u32 %s341_s22, 4  ;;  %s209_s23 = int_to_ptr.vmem [resolvable:$true] %s208_s23 }
  0x28   :  { %v49_v5 = vld [vmem:[#allocation2] sm:$0xff]  ;;  %v252_v6 = vpack.c.bf16 %v54_v4, %v53_v2  ;;  %v50_v7 = vld [vmem:[#allocation2 + $0x8] sm:$0xff]  ;;  %v186_v39 = vshrl.u32 %v185_v38, 7  ;;  %p314_p3 = scmp.lt.s32.totalorder %s209_s23, %s209_s23 }
  0x29   :  { %243 = vmatprep.mubr.msk.f32.mxu0 %vm62_vm0, %v49_v5  ;;  %248 = vmatprep.subr.msk.bf16.mxu0 %vm247_vm1, %v246_v3  ;;  %v221_v8 = vld [vmem:[%s438_s2] ss:$0 sm:$0xff] }
  0x2a   :  { %251 = vmatpush3.bf16.xpose.msk.msra.mxu0 %vm247_vm1, %v246_v3  ;;  %v182_v40 = vld [vmem:[%s439_s3] sm:$0x1]  ;;  %v187_v41 = vsub.s32 0, %v186_v39  ;;  %s309_s3 = scalar_lea.vmem %s209_s23, 256 }
  0x2b   :  { %254 = vmatprep.subr.msk.bf16.mxu0 %vm247_vm1, %v252_v6  ;;  %v228_v45 = vld [vmem:[%s440_s4] ss:$0 sm:$0xff]  ;;  %p310_p2 = scmp.ne.s32.totalorder %s209_s23, %s309_s3  ;;  %p315_p4 = scmp.lt.s32.totalorder %s309_s3, %s309_s3 }
  0x2d   :  { %p316_p5 = por %p315_p4, %p314_p3 }
  0x2f   :  { %p317_p6 = pnand %p316_p5, %p310_p2 }
  0x32   :  { %257 = vmatpush3.bf16.xpose.msk.msra.mxu0 %vm247_vm1, %v252_v6 }
  0x39   :  { %244 = vmatmul.mubr.msk.f32.vlgmr.msra.gmra.mrb[0].mxu0 %vm62_vm0, %v50_v7 }
 0x10c   :  { %v245_v9 = vpop.f32.mrb[0].mxu0 }
 0x10d   :  { %v153_v10 = vadd.f32 %v245_v9, %v221_v8  ;;  %v147_v11 = vpop.f32.mrb[1].mxu0 }
 0x10e   :  { %v148_v12 = vadd.f32 %v221_v8, %v147_v11 }
 0x10f   :  { %v157_v13 = vsel %vm62_vm0, %v153_v10, 0.0 }
 0x110   :  { %v156_v14 = vsel %vm62_vm0, %v148_v12, 0.0 }
 0x111   :  { %v158_v15 = vadd.f32 %v157_v13, %v156_v14 }
 0x113   :  { %v159_v16 = vrot.slane %v158_v15, 4 }
 0x115   :  { %v160_v17 = vadd.f32 %v159_v16, %v158_v15 }
 0x117   :  { %v161_v18 = vrot.slane %v160_v17, 2 }
 0x119   :  { %v162_v19 = vadd.f32 %v161_v18, %v160_v17 }
 0x11b   :  { %v163_v20 = vrot.slane %v162_v19, 1 }
 0x11d   :  { %v164_v21 = vadd.f32 %v163_v20, %v162_v19 }
 0x11f   :  { %v165_v22 = vmul.f32 0.0625, %v164_v21 }
 0x121   :  { %v166_v23 = vsub.f32 %v148_v12, %v165_v22  ;;  %v167_v24 = vsub.f32 %v153_v10, %v165_v22 }
 0x123   :  { %v168_v25 = vmul.f32 %v166_v23, %v166_v23  ;;  %v169_v26 = vmul.f32 %v167_v24, %v167_v24 }
 0x125   :  { %v170_v27 = vsel %vm62_vm0, %v168_v25, 0.0  ;;  %v171_v28 = vsel %vm62_vm0, %v169_v26, 0.0 }
 0x126   :  { %v172_v29 = vadd.f32 %v171_v28, %v170_v27 }
 0x128   :  { %v173_v30 = vrot.slane %v172_v29, 4 }
 0x12a   :  { %v174_v31 = vadd.f32 %v173_v30, %v172_v29 }
 0x12c   :  { %v175_v32 = vrot.slane %v174_v31, 2 }
 0x12e   :  { %v176_v33 = vadd.f32 %v175_v32, %v174_v31 }
 0x130   :  { %v177_v34 = vrot.slane %v176_v33, 1 }
 0x132   :  { %v178_v35 = vadd.f32 %v177_v34, %v176_v33 }
 0x134   :  { %v179_v36 = vmul.f32 0.0625, %v178_v35 }
 0x136   :  { %v180_v37 = vadd.f32 1e-05, %v179_v36 }
 0x138   :  { %263 = vrsqrt.f32 %v180_v37 }
 0x142   :  { %v264_v42 = vpop.eup %263 }
 0x143   :  { %v183_v43 = vmul.f32 %v264_v42, %v182_v40 }
 0x145   :  { %v188_v44 = vrot.slane %v183_v43, %v187_v41 }
 0x147   :  { %v190_v46 = vmul.f32 %v188_v44, %v166_v23  ;;  %v191_v47 = vmul.f32 %v188_v44, %v167_v24 }
 0x149   :  { %v199_v48 = vadd.f32 %v228_v45, %v190_v46  ;;  %v200_v49 = vadd.f32 %v228_v45, %v191_v47 }
 0x14b   :  { %201 = vst.msk [vmem:[#allocation7] sm:$0xff] %vm62_vm0, %v199_v48  ;;  %202 = vst.msk [vmem:[#allocation7 + $0x8] sm:$0xff] %vm62_vm0, %v200_v49 }
 0x14c   :  { %320 = shalt.err (!%p317_p6)
}
 0x14d   :  { %s321_s25 = scalar_lea.hbm %s441_s5, 256 }
 0x14e   :  { %p322_p7 = scmp.ne.s32.totalorder %s441_s5, %s321_s25  ;;  %p325_p8 = scmp.lt.u32.totalorder %s321_s25, %s441_s5 }
 0x150   :  { %p327_p9 = pnand %p325_p8, %p322_p7 }
 0x152   :  { %330 = shalt.err (!%p327_p9)
}
 0x153   :  { %214 = dma.vmem_to_hbm [thread:$0]  %s209_s23, 256, %s441_s5, [#allocation4], %s338_s28, %s338_s28, %s339_s29  }
 0x154   :  { %335 = dma.done.wait [#allocation4], 256  }
 0x155   :  { %336 = vsyncadd [#allocation4], 4294967040 }
 0x156   :  { %218 = vsyncpa [#allocation3], 1 }
 0x157   :  { %219 = vsyncpa [#allocation6], 1 }
 0x158   :  { %220 = vsyncpa [#allocation4], 1 }

</bundles_post_ra>
